<compile_context>
chip_gen: v5e
topology: v5e:2x2
jax: 0.10.0
libtpu: 0.0.40
codegen_flags: <defaults>
</compile_context>

<pallas_src>
import numpy as np
import jax
import jax.numpy as jnp
from jax.experimental import pallas as pl
from jax.experimental.pallas import tpu as pltpu


def make_simpson_weights(num_intervals: int, interval_width: float) -> jnp.ndarray:
    """Deterministic parameter init, mirroring SimpsonQuadrature.__init__."""
    if num_intervals % 2 != 0:
        raise NotImplementedError("Error, please specify an even number of intervals")
    weights = np.zeros(num_intervals + 1, dtype=np.float32)
    for j in range(1, num_intervals // 2 + 1):
        weights[2 * j - 2] += 1.0
        weights[2 * j - 1] += 4.0
        weights[2 * j] += 1.0
    weights *= interval_width / 3.0
    return jnp.asarray(weights, dtype=jnp.float32)


def _simpson_kernel(w_ref, x_ref, o_ref):
    # w_ref: VMEM (1, N1, 1)  f32 quadrature weights (same block every step)
    # x_ref: VMEM (BT, N1, TL) integrand samples for this (batch-tile, lane-tile)
    # o_ref: VMEM (BT, TL)     quadrature result tile
    xw = x_ref[...].astype(jnp.float32) * w_ref[...]   # one cast + one FMA-class mul
    o_ref[...] = jnp.sum(xw, axis=1).astype(o_ref.dtype)  # sublane (XLU) reduce over N1


def _round_up(a: int, b: int) -> int:
    return (a + b - 1) // b * b


def simpson_quadrature(
    x: jnp.ndarray,
    weights: jnp.ndarray,
    dim: int = 1,
    target_tile_bytes: int = 8 << 20,  # per input buffer; x2 for double-buffering
) -> jnp.ndarray:
    """Weighted reduction of x along axis `dim` with Simpson weights."""
    if dim < 0:
        dim += x.ndim
    n1 = int(weights.shape[0])
    assert x.shape[dim] == n1, "quadrature axis length must match weights"

    lead = x.shape[:dim]
    trail = x.shape[dim + 1:]
    b = int(np.prod(lead)) if lead else 1
    l = int(np.prod(trail)) if trail else 1

    # Match torch type promotion: f32 weights promote bf16/f16 x to f32 output.
    out_dtype = jnp.result_type(x.dtype, jnp.float32)
    in_item = jnp.dtype(x.dtype).itemsize
    out_item = jnp.dtype(out_dtype).itemsize

    # Contiguous reshapes only (no transpose, no pad).
    x3 = x.reshape(b, n1, l)
    w3 = jnp.asarray(weights, jnp.float32).reshape(1, n1, 1)

    # --- Tile sizing ---------------------------------------------------------
    l128 = _round_up(max(l, 1), 128)
    bt_min = b if b <= 8 else 8                      # output block: == b or multiple of 8
    tl = (target_tile_bytes // max(1, bt_min * n1 * in_item)) // 128 * 128
    tl = max(128, min(tl, l128))                     # lane tile: multiple of 128
    bt_budget = max(bt_min, target_tile_bytes // max(1, n1 * tl * in_item))
    if bt_budget >= b:
        bt = b
    else:                                            # here b > 8 necessarily
        bt = max(8, (bt_budget // 8) * 8)

    # v7x megacore: make sure there are >= 2 grid steps when there is anything to split.
    if pl.cdiv(b, bt) * pl.cdiv(l, tl) < 2:
        if l > 128:
            tl = max(128, _round_up(-(-l // 2), 128))  # halve the lane axis
        elif b > 8:
            bt = 8

    grid = (pl.cdiv(b, bt), pl.cdiv(l, tl))

    out = pl.pallas_call(
        _simpson_kernel,
        out_shape=jax.ShapeDtypeStruct((b, l), out_dtype),
        grid_spec=pltpu.PrefetchScalarGridSpec(
            num_scalar_prefetch=0,
            grid=grid,
            in_specs=[
                pl.BlockSpec((1, n1, 1), lambda bi, li: (0, 0, 0)),       # weights
                pl.BlockSpec((bt, n1, tl), lambda bi, li: (bi, 0, li)),   # x tile
            ],
            out_specs=pl.BlockSpec((bt, tl), lambda bi, li: (bi, li)),
        ),
        compiler_params=pltpu.CompilerParams(
            dimension_semantics=("parallel", "parallel"),
            vmem_limit_bytes=40 << 20,
        ),
        cost_estimate=pl.CostEstimate(
            flops=2 * b * n1 * l,
            transcendentals=0,
            bytes_accessed=b * n1 * l * in_item + b * l * out_item + n1 * 4,
        ),
    )(w3, x3)

    return out.reshape(lead + trail)


if __name__ == "__main__":
    # Deterministic example consistent with the module's forward:
    # num_intervals=8 (even), interval_width=0.1, x shape (B=2, N+1=9, H=16, W=16)
    num_intervals = 8
    interval_width = 0.1
    B, H, W = 2, 16, 16

    weights = make_simpson_weights(num_intervals, interval_width)
    w_bcast = weights.reshape(1, -1, 1, 1)

    key = jax.random.PRNGKey(0)
    k1, k2, k3, k4 = jax.random.split(key, 4)

    # Test 1: the shipped shape (L = 256, lane-tile split across both TCs).
    x1 = jax.random.normal(k1, (B, num_intervals + 1, H, W), dtype=jnp.float32)
    out1 = jax.block_until_ready(simpson_quadrature(x1, weights))
    ref1 = jnp.sum(x1 * w_bcast, axis=1)
    np.testing.assert_allclose(np.asarray(out1), np.asarray(ref1), rtol=1e-6, atol=1e-6)

    # Test 2: ragged lane tile (L = 10*12 = 120, no jnp.pad, masked edge block).
    x2 = jax.random.normal(k2, (B, num_intervals + 1, 10, 12), dtype=jnp.float32)
    out2 = jax.block_until_ready(simpson_quadrature(x2, weights))
    ref2 = jnp.sum(x2 * w_bcast, axis=1)
    np.testing.assert_allclose(np.asarray(out2), np.asarray(ref2), rtol=1e-6, atol=1e-6)

    # Test 3: batch-tiled path (B = 64 split into BT = 8 row tiles).
    x3 = jax.random.normal(k3, (64, num_intervals + 1, 10, 12), dtype=jnp.float32)
    out3 = jax.block_until_ready(simpson_quadrature(x3, weights))
    ref3 = jnp.sum(x3 * w_bcast, axis=1)
    np.testing.assert_allclose(np.asarray(out3), np.asarray(ref3), rtol=1e-6, atol=1e-6)

    # Test 4: bf16 input promotes to f32 output (matching torch's f32-parameter promotion).
    x4 = jax.random.normal(k4, (B, num_intervals + 1, H, W), dtype=jnp.bfloat16)
    out4 = jax.block_until_ready(simpson_quadrature(x4, weights))
    assert out4.dtype == jnp.float32
    ref4 = jnp.sum(x4.astype(jnp.float32) * w_bcast, axis=1)
    np.testing.assert_allclose(np.asarray(out4), np.asarray(ref4), rtol=1e-5, atol=1e-5)

    print("KERNEL_OK")
</pallas_src>

<mosaic_0001>
module attributes {stable_mosaic.version = 11 : i64} {
  func.func @_simpson_kernel(%arg0: i32, %arg1: i32, %arg2: memref<1x9x1xf32, #tpu.memory_space<vmem>>, %arg3: memref<2x9x128xf32, #tpu.memory_space<vmem>>, %arg4: memref<2x128xf32, #tpu.memory_space<vmem>>) attributes {dimension_semantics = [#tpu.dimension_semantics<parallel>, #tpu.dimension_semantics<parallel>], iteration_bounds = array<i64: 1, 2>, scalar_prefetch = 0 : i64, scratch_operands = 0 : i64, tpu.core_type = #tpu.core_type<tc>, window_params = [{pipeline_mode = #tpu.pipeline_mode<synchronous>, transform_indices = @transform_0, window_bounds = array<i64: 1, 9, 1>}, {transform_indices = @transform_1, window_bounds = array<i64: 2, 9, 128>}, {transform_indices = @transform_2, window_bounds = array<i64: 2, 128>}]} {
    %c0 = arith.constant 0 : index
    %c0_0 = arith.constant 0 : index
    %c0_1 = arith.constant 0 : index
    %0 = vector.load %arg3[%c0, %c0_0, %c0_1] : memref<2x9x128xf32, #tpu.memory_space<vmem>>, vector<2x9x128xf32>
    %c0_2 = arith.constant 0 : index
    %c0_3 = arith.constant 0 : index
    %c0_4 = arith.constant 0 : index
    %1 = vector.load %arg2[%c0_2, %c0_3, %c0_4] : memref<1x9x1xf32, #tpu.memory_space<vmem>>, vector<1x9x1xf32>
    %2 = vector.broadcast %1 : vector<1x9x1xf32> to vector<2x9x128xf32>
    %3 = arith.mulf %0, %2 : vector<2x9x128xf32>
    %cst = arith.constant dense<0.000000e+00> : vector<2x128xf32>
    %4 = vector.multi_reduction <add>, %3, %cst [1] : vector<2x9x128xf32> to vector<2x128xf32>
    %c0_5 = arith.constant 0 : index
    %c0_6 = arith.constant 0 : index
    %5 = vector.load %arg4[%c0_5, %c0_6] : memref<2x128xf32, #tpu.memory_space<vmem>>, vector<2x128xf32>
    tpu.vector_store %arg4[%c0_5, %c0_6], %4 {strides = array<i32>} : memref<2x128xf32, #tpu.memory_space<vmem>>, vector<2x128xf32>,
    return
  }
  func.func @transform_0(%arg0: i32, %arg1: i32) -> (i32, i32, i32) {
    %c0_i32 = arith.constant 0 : i32
    %c0_i32_0 = arith.constant 0 : i32
    %c0_i32_1 = arith.constant 0 : i32
    %c0_i32_2 = arith.constant 0 : i32
    return %c0_i32, %c0_i32_0, %c0_i32_1 : i32, i32, i32
  }
  func.func @transform_1(%arg0: i32, %arg1: i32) -> (i32, i32, i32) {
    %c0_i32 = arith.constant 0 : i32
    %c0_i32_0 = arith.constant 0 : i32
    return %arg0, %c0_i32, %arg1 : i32, i32, i32
  }
  func.func @transform_2(%arg0: i32, %arg1: i32) -> (i32, i32) {
    %c0_i32 = arith.constant 0 : i32
    return %arg0, %arg1 : i32, i32
  }
}

</mosaic_0001>

<bundles_post_ra>
// kernel: tpu_custom_call.1
= control target key start
LH: loop header
LB: loop body
LE: loop exit
PB: predicated region body
PF: predicated region fallthrough
CT: control target
= control target key end

     0   :  { %7 = vsyncpa [#allocation4], 0  ;;  %s626_s0 = inlined_call_operand.vmem [shape: f32[1,9,1], index: 0, kind: input, shape index: {}]   ;;  %s627_s1 = inlined_call_operand.vmem [shape: f32[2,9,256], index: 1, kind: input, shape index: {}]   ;;  %s628_s2 = inlined_call_operand.hbm [shape: f32[2,256], index: 2, kind: output, shape index: {}]  }
   0x1   :  { %9 = vsyncpa [#allocation4 + $0x1], 0  ;;  %s513_s9 = smov 0   ;;  %s515_s10 = smov 0  }
   0x2   :  { %s517_s11 = smov 0   ;;  %s519_s12 = smov 0  }
   0x3   :  { %s521_s13 = smov 0   ;;  %s523_s14 = smov 0  }
   0x4 LB: > { %s347_s15 = sadd.s32 4294967295, %s495_s14   ;;  %s348_s16 = sadd.s32 4294967294, %s495_s14   ;;  %s495_s14 = sphi %s523_s14, %s15_s14   ;;  %s491_s13 = sphi %s521_s13, %s635_s13   ;;  %s487_s12 = sphi %s519_s12, %s634_s12   ;;  %s483_s11 = sphi %s517_s11, %s633_s11   ;;  %s479_s10 = sphi %s515_s10, %s632_s10   ;;  %s475_s9 = sphi %s513_s9, %s631_s9  }
   0x5   : > { %s24_s17 = sadd.s32 1, %s491_s13  ;;  %s57_s18 = sadd.s32 1, %s483_s11 }
   0x6   : > { %p25_p0 = scmp.ge.s32.totalorder %s24_s17, 2  ;;  %p64_p1 = scmp.ne.s32.totalorder %s483_s11, %s479_s10 }
   0x7   : > { %p65_p2 = scmp.eq.s32.totalorder %s495_s14, 0  ;;  %p96_p3 = scmp.eq.s32.totalorder %s347_s15, 1 }
   0x8   : > { %s637_s17 = smov (%p25_p0, %s24_s17), 0  ;;  %p101_p6 = scmp.ne.s32.totalorder %s479_s10, %s475_s9 }
   0x9   : > { %p66_p4 = por %p65_p2, %p64_p1  ;;  %p552_p5 = por %p96_p3, %p64_p1 }
   0xa   : > { %s53_s20 = ssub.s32 %s491_s13, %s637_s17  ;;  %p102_p8 = scmp.eq.s32.totalorder %s348_s16, 1 }
   0xb   : > { %p55_p7 = scmp.eq.s32.totalorder %s53_s20, 0  ;;  %p350_p10 = scmp.ge.s32.totalorder %s495_s14, 2 }
   0xc   : > { %p563_p9 = por %p102_p8, %p101_p6 }
   0xd   : > { %s561_s21 = scalar_select %p55_p7, %s483_s11, %s57_s18  }
   0xe   : > { %121 = sbr.rel (%p350_p10) target bundleno = 27 (0x1b), region = 20 }
  0x13   : > { %124 = sbr.rel (!%p66_p4) target bundleno = 27 (0x1b), region = 24  ;;  %s126_s23 = sand.u32 (%p66_p4), 1, %s483_s11  }
  0x14   : > { %s352_s24 = sshll.u32 (%p66_p4), %s491_s13, 3  ;;  %s351_s25 = sshll.u32 (%p66_p4), %s126_s23, 5 }
  0x15   : > { %s133_s28 = scalar_lea.vmem (%p66_p4), %s627_s1, %s352_s24  ;;  %s128_s29 = scalar_lea.vmem (%p66_p4), [#allocation2], %s351_s25 }
  0x16   : > { %v168_v0 = vld [vmem:[%s133_s28] sm:$0xff] (%p66_p4)  ;;  %v170_v1 = vld [vmem:[%s133_s28 + $0x10] sm:$0xff] (%p66_p4) }
  0x17   : > { %v172_v2 = vld [vmem:[%s133_s28 + $0x20] sm:$0xff] (%p66_p4)  ;;  %169 = vst [vmem:[%s128_s29] sm:$0xff] (%p66_p4), %v168_v0  ;;  %v174_v3 = vld [vmem:[%s133_s28 + $0x30] sm:$0xff] (%p66_p4) }
  0x18   : > { %171 = vst [vmem:[%s128_s29 + $0x8] sm:$0xff] %v170_v1 }
  0x19   : > { %173 = vst [vmem:[%s128_s29 + $0x10] sm:$0xff] %v172_v2 }
  0x1a   : > { %175 = vst [vmem:[%s128_s29 + $0x18] sm:$0xff] %v174_v3 }
  0x1b PF: > { %p353_p11 = scmp.ge.s32.totalorder %s495_s14, 1  ;;  %p180_p12 = scmp.lt.s32.totalorder %s495_s14, 3 }
  0x1d   : > { %p181_p13 = pnand %p353_p11, %p180_p12 }
  0x1e   : > { %s584_s6 = sand.u32 (!%p181_p13), 1, %s479_s10   ;;  %s357_s16 = sshll.u32 (!%p181_p13), %s487_s12, 1 }
  0x1f   : > { %184 = sbr.rel (%p181_p13) target bundleno = 181 (0xb5), region = 62  ;;  %s354_s7 = sshll.u32 (!%p181_p13), %s584_s6, 5 }
  0x20   : > { %s189_s8 = scalar_lea.vmem (!%p181_p13), [#allocation2], %s354_s7  ;;  %s355_s15 = sshll.u32 (!%p181_p13), %s584_s6, 1 }
  0x21   : > { %s265_s23 = scalar_lea.hbm (!%p181_p13), %s628_s2, %s357_s16  ;;  %s207_s24 = scalar_lea.vmem (!%p181_p13), [#allocation3], %s355_s15 }
  0x22   : > { %s267_s25 = sshll.u32 (!%p181_p13), %s207_s24, 4  ;;  %s269_s26 = sshll.u32 (!%p181_p13), %s265_s23, 4  ;;  %s268_s25 = int_to_ptr.vmem [resolvable:$true] %s267_s25  ;;  %s270_s26 = int_to_ptr.hbm [resolvable:$true] %s269_s26 }
  0x23   : > { %s253_s12 = scalar_lea.sflag (!%p181_p13), [#allocation4], %s584_s6  ;;  %s431_s27 = sshra.s32 (!%p181_p13), %s270_s26, 4  ;;  %s432_s27 = int_to_ptr.hbm [resolvable:$true] %s431_s27 }
  0x24   : > { %v214_v4 = vld [vmem:[%s626_s0 + $0x8] sm:$0x1]  ;;  %v497_v5 = vmov 0   ;;  %v213_v6 = vld [vmem:[%s626_s0] sm:$0xff]  ;;  %v212_v9 = vld [vmem:[%s189_s8 + $0x18] sm:$0x1]  ;;  %p438_p3 = scmp.lt.s32.totalorder %s432_s27, %s628_s2 }
  0x25   : > { %416 = vset.pattern.permute.xlu0 %v497_v5  ;;  %v210_v8 = vld [vmem:[%s189_s8 + $0x8] sm:$0x1]  ;;  %v209_v12 = vld [vmem:[%s189_s8] sm:$0xff]  ;;  %v211_v13 = vld [vmem:[%s189_s8 + $0x10] sm:$0xff]  ;;  %vm229_vm0 = vcmask 1040384   ;;  %vm248_vm1 = vcmask 1041409  }
  0x26   : > { %222 = vperm.xlu0 %416, %v214_v4   ;;  %s433_s28 = scalar_lea.hbm %s432_s27, 2  ;;  %s437_s3 = scalar_lea.hbm %s628_s2, 4 }
  0x27   : > { %p434_p0 = scmp.ne.s32.totalorder %s432_s27, %s433_s28  ;;  %p439_p4 = scmp.lt.s32.totalorder %s437_s3, %s433_s28 }
  0x29   : > { %p435_p1 = pnand %p434_p0, %p552_p5  ;;  %p440_p6 = por %p439_p4, %p438_p3 }
  0x2b   : > { %p436_p2 = pneg %p435_p1 }
  0x2d   : > { %p441_p7 = pnand %p440_p6, %p436_p2 }
  0x2e   : > { %217 = vperm.xlu0 %416, %v213_v6  }
  0x98   : > { %v223_v7 = vpop.permute.xlu0 %222 }
  0x99   : > { %v226_v10 = vmul.f32 %v223_v7, %v210_v8  ;;  %v228_v11 = vmul.f32 %v223_v7, %v212_v9 }
  0x9b   : > { %v230_v17 = vsel %vm229_vm0, %v226_v10, 0.0  ;;  %v238_v18 = vsel %vm229_vm0, %v228_v11, 0.0 }
  0xa0   : > { %v218_v14 = vpop.permute.xlu0 %217 }
  0xa1   : > { %v225_v15 = vmul.f32 %v218_v14, %v209_v12  ;;  %v227_v16 = vmul.f32 %v218_v14, %v211_v13 }
  0xa3   : > { %v231_v19 = vadd.f32 %v230_v17, %v225_v15  ;;  %v239_v20 = vadd.f32 %v238_v18, %v227_v16 }
  0xa5   : > { %v232_v21 = vrot.slane %v231_v19, 4  ;;  %v240_v22 = vrot.slane %v239_v20, 4 }
  0xa7   : > { %v233_v23 = vadd.f32 %v232_v21, %v231_v19  ;;  %v241_v24 = vadd.f32 %v240_v22, %v239_v20 }
  0xa9   : > { %v234_v25 = vrot.slane %v233_v23, 2  ;;  %v242_v26 = vrot.slane %v241_v24, 2 }
  0xab   : > { %v235_v27 = vadd.f32 %v234_v25, %v233_v23  ;;  %v243_v28 = vadd.f32 %v242_v26, %v241_v24 }
  0xad   : > { %v236_v29 = vrot.slane %v235_v27, 1  ;;  %v244_v30 = vrot.slane %v243_v28, 1 }
  0xaf   : > { %v237_v31 = vadd.f32 %v236_v29, %v235_v27  ;;  %v245_v32 = vadd.f32 %v244_v30, %v243_v28 }
  0xb1   : > { %v249_v33 = vsel %vm248_vm1, %v245_v32, %v237_v31 }
  0xb2   : > { %251 = vst [vmem:[%s207_s24] sm:$0x3] %v249_v33 }
  0xb3   : > { %444 = shalt.err (!%p441_p7)
}
  0xb4   : > { %360 = dma.vmem_to_hbm [thread:$0]  (%p552_p5), %s268_s25, 32, %s270_s26, %s253_s12  }
  0xb5 PF: > { %s281_s6 = sand.u32 1, %s475_s9   ;;  %p363_p8 = pnand %p350_p10, %p563_p9 }
  0xb6   : > { %s282_s7 = scalar_lea.sflag [#allocation4], %s281_s6 }
  0xb7   : > { %p364_p11 = pneg %p363_p8 }
  0xb9   : > { %470 = dma.done.wait (%p364_p11), %s282_s7, 32  }
  0xba   : > { %472 = vsyncadd (%p364_p11), %s282_s7, 4294967264  ;;  %s15_s14 = sadd.s32 1, %s495_s14   ;;  %s631_s9 = smov %s479_s10 }
  0xbb   : > { %p12_p12 = scmp.ge.s32.totalorder %s15_s14, 4   ;;  %s632_s10 = smov %s483_s11 }
  0xbc   : > { %s633_s11 = smov %s561_s21  ;;  %s634_s12 = smov %s491_s13 }
  0xbd   : > { %s635_s13 = smov %s637_s17  ;;  %14 = sbr.rel (!%p12_p12) target bundleno = 4 (0x4), region = 106 }
  0xc2   :  { %288 = vsyncpa [#allocation4], 1 }
  0xc3   :  { %290 = vsyncpa [#allocation4 + $0x1], 1 }

</bundles_post_ra>
